<compile_context>
chip_gen: v5e
topology: v5e:2x2
jax: 0.10.0
libtpu: 0.0.40
codegen_flags: <defaults>
</compile_context>

<pallas_src>
import functools

import jax
import jax.numpy as jnp
from jax.experimental import pallas as pl
from jax.experimental.pallas import tpu as pltpu

NO_EDGE_OFFSET_T_CONORM = 0.0
NO_EDGE_OFFSET_T_NORM = 1.0

# Static problem configuration (mirrors the module's __init__ args).
N_SAMPLES = 256            # small demo batch; = 2 grid steps of 128 lanes
IN_FEATURES = 16
OUT_FEATURES = 8           # OUT_FEATURES * IN_FEATURES = 128 -> one full sublane column
OPERATORS = ("t_norm", "t_conorm")   # one T_Norm (min) and one T_Conorm (max)
N_OPS = len(OPERATORS)

# Edge-type codes: 0 = positive edge (x), 1 = negated edge (1 - x), 2 = no_edge.
EDGE_POS, EDGE_NEG, EDGE_NONE = 0, 1, 2


def node_counting_kernel(x_ref, a_ref, b_ref, s_ref, out_ref, *,
                         out_features, in_features):
    """One lane tile of the batch: affine edge transform + grouped sublane min.

    x_ref   : (IN, TN)         f32  inputs, batch on lanes (lane-dense load)
    a_ref   : (OUT, IN, 1)     f32  sign-folded affine scale  (A = sign * a)
    b_ref   : (OUT, IN, 1)     f32  sign-folded affine offset (B = sign * b)
    s_ref   : (OUT, 1)         f32  per-node sign (+1 t_norm, -1 t_conorm)
    out_ref : (OUT, TN)        f32  outputs, batch on lanes (lane-dense store)
    """
    x = x_ref[...]                              # (IN, TN)   one unmasked load
    a3 = a_ref[...]                             # (OUT, IN, 1)
    b3 = b_ref[...]
    s = s_ref[...]                              # (OUT, 1)

    # Signed edge values for the whole (OUT*IN) problem in one slab:
    #   sv[j, i, n] = sign[j] * edge_value_{j,i}(x[i, n])
    # (edge type + selected-operator no-edge identity + max=-min(-v) sign are all
    #  pre-folded into A/B in the wrapper, so this is just one mul + one add).
    sv = a3 * x[None, :, :] + b3                # (OUT, IN, TN)

    # Grouped sublane reduction over IN; never touches the 128-lane axis.
    red = jnp.min(sv, axis=1)                   # (OUT, TN)

    # Undo the sign fold: t_conorm nodes computed max(v) as -min(-v).
    out_ref[...] = s * red                      # lane-dense store


def build_affine_params(edge_codes, selection, operators=OPERATORS):
    """Fold edge types + hard operator selection into per-edge affine coeffs.

    Returns A, B of shape (OUT, IN, 1) and S of shape (OUT, 1) such that
      signed_value[j,i](x) = A[j,i]*x + B[j,i]   and   out[j] = S[j] * min_i signed_value.
    Valid because x in [0,1] and selection is a hard one-hot (max_k(sel*v) == selected v).
    """
    f_out, f_in = edge_codes.shape
    op_idx = jnp.argmax(selection, axis=-1)                               # (OUT,)
    is_tnorm_op = jnp.array([op == "t_norm" for op in operators])         # (N_OPS,)
    node_is_tnorm = is_tnorm_op[op_idx]                                   # (OUT,)
    sign = jnp.where(node_is_tnorm, 1.0, -1.0).astype(jnp.float32)        # (OUT,)
    identity = jnp.where(node_is_tnorm,
                         jnp.float32(NO_EDGE_OFFSET_T_NORM),
                         jnp.float32(NO_EDGE_OFFSET_T_CONORM))            # (OUT,)

    is_pos = edge_codes == EDGE_POS
    is_neg = edge_codes == EDGE_NEG
    is_none = edge_codes == EDGE_NONE
    # edge_value(x) = a*x + b   (pos: x; neg: 1-x; no_edge: per-op identity)
    a = jnp.where(is_pos, 1.0, jnp.where(is_neg, -1.0, 0.0)).astype(jnp.float32)
    b = jnp.where(is_neg, 1.0,
                  jnp.where(is_none, identity[:, None], 0.0)).astype(jnp.float32)

    A = (sign[:, None] * a)[..., None]          # (OUT, IN, 1)
    B = (sign[:, None] * b)[..., None]          # (OUT, IN, 1)
    S = sign[:, None]                           # (OUT, 1)
    return A, B, S


def node_counting_forward(x, edge_codes, selection, *, lane_tile=None):
    """Wrapper: transpose batch onto lanes, pad/tile it, and call the kernel."""
    n, f_in = x.shape
    f_out, f_in2 = edge_codes.shape
    assert f_in2 == f_in

    A, B, S = build_affine_params(edge_codes, selection)

    # Batch on lanes (lane-dense loads/stores); transpose is wrapper-side plumbing.
    x_t = x.T.astype(jnp.float32)                       # (IN, N)

    # Lane tile: >=128 (full lanes) whenever possible; >=2 grid steps for realistic
    # batches so v7x's second TensorCore gets work; whole batch for tiny demos.
    if lane_tile is None:
        if n >= 1024:
            lane_tile = 512
        elif n >= 128:
            lane_tile = 128
        else:
            lane_tile = n                               # single full-array block
    n_pad = ((n + lane_tile - 1) // lane_tile) * lane_tile
    if n_pad != n:
        x_t = jnp.pad(x_t, ((0, 0), (0, n_pad - n)))    # padded lanes sliced off below
    grid = (n_pad // lane_tile,)

    kernel = functools.partial(node_counting_kernel,
                               out_features=f_out, in_features=f_in)

    out_t = pl.pallas_call(
        kernel,
        out_shape=jax.ShapeDtypeStruct((f_out, n_pad), jnp.float32),
        grid=grid,
        in_specs=[
            pl.BlockSpec((f_in, lane_tile), lambda i: (0, i)),
            pl.BlockSpec((f_out, f_in, 1), lambda i: (0, 0, 0)),
            pl.BlockSpec((f_out, f_in, 1), lambda i: (0, 0, 0)),
            pl.BlockSpec((f_out, 1), lambda i: (0, 0)),
        ],
        out_specs=pl.BlockSpec((f_out, lane_tile), lambda i: (0, i)),
        # Batch axis is embarrassingly parallel -> shard across the 2 TCs on v7x.
        compiler_params=pltpu.CompilerParams(dimension_semantics=("parallel",)),
    )(x_t, A, B, S)

    return out_t[:, :n].T                               # back to (N, OUT)


def gumbel_softmax_hard(key, logits):
    """F.gumbel_softmax(..., hard=True) forward path: hard one-hot of (logits + gumbel)."""
    g = jax.random.gumbel(key, logits.shape, dtype=jnp.float32)
    idx = jnp.argmax(logits + g, axis=-1)
    return jax.nn.one_hot(idx, logits.shape[-1], dtype=jnp.float32)


def reference_forward(x, edge_codes, sel):
    """Pure-JAX reference of the module's forward()."""
    base = jnp.where(edge_codes[None] == EDGE_NEG, 1.0 - x[:, None, :], x[:, None, :])
    noedge = (edge_codes[None] == EDGE_NONE)
    ntv = []
    for op in OPERATORS:
        if op == "t_norm":
            ev = jnp.where(noedge, NO_EDGE_OFFSET_T_NORM, base)
            ntv.append(jnp.min(ev, axis=-1))
        else:
            ev = jnp.where(noedge, NO_EDGE_OFFSET_T_CONORM, base)
            ntv.append(jnp.max(ev, axis=-1))
    ntv = jnp.stack(ntv, axis=-1)                       # (N, F_out, N_OPS)
    return jnp.max(sel[None] * ntv, axis=-1)            # (N, F_out)


if __name__ == "__main__":
    key = jax.random.PRNGKey(0)
    k_x, k_sel = jax.random.split(key)

    # Inputs are fuzzy truth values in [0, 1].
    x = jax.random.uniform(k_x, (N_SAMPLES, IN_FEATURES), dtype=jnp.float32)

    # Deterministic edge-type assignment per (output node, input feature).
    edge_codes = (
        (jnp.arange(OUT_FEATURES)[:, None] + jnp.arange(IN_FEATURES)[None, :]) % 3
    ).astype(jnp.int32)

    # node_type_count parameter is zeros(out_features, n_ops) in __init__;
    # gumbel_softmax(hard=True) over it gives a one-hot operator selection per node.
    node_type_count = jnp.zeros((OUT_FEATURES, N_OPS), dtype=jnp.float32)
    selection = gumbel_softmax_hard(k_sel, node_type_count)   # (F_out, N_OPS)

    out = node_counting_forward(x, edge_codes, selection)
    out = jax.block_until_ready(out)

    ref = reference_forward(x, edge_codes, selection)
    assert out.shape == (N_SAMPLES, OUT_FEATURES)
    assert jnp.allclose(out, ref, atol=1e-6), "Pallas kernel mismatch vs reference"

    # TODO(synk): forward_with_indices (argmin/argmax index tracking) is not part of
    # forward() and is left unimplemented.
    print("KERNEL_OK")
</pallas_src>

<mosaic_0001>
module attributes {stable_mosaic.version = 11 : i64} {
  func.func @node_counting_kernel(%arg0: i32, %arg1: memref<16x128xf32, #tpu.memory_space<vmem>>, %arg2: memref<8x16x1xf32, #tpu.memory_space<vmem>>, %arg3: memref<8x16x1xf32, #tpu.memory_space<vmem>>, %arg4: memref<8x1xf32, #tpu.memory_space<vmem>>, %arg5: memref<8x128xf32, #tpu.memory_space<vmem>>) attributes {dimension_semantics = [#tpu.dimension_semantics<parallel>], iteration_bounds = array<i64: 2>, scalar_prefetch = 0 : i64, scratch_operands = 0 : i64, tpu.core_type = #tpu.core_type<tc>, window_params = [{transform_indices = @transform_0, window_bounds = array<i64: 16, 128>}, {pipeline_mode = #tpu.pipeline_mode<synchronous>, transform_indices = @transform_1, window_bounds = array<i64: 8, 16, 1>}, {pipeline_mode = #tpu.pipeline_mode<synchronous>, transform_indices = @transform_2, window_bounds = array<i64: 8, 16, 1>}, {pipeline_mode = #tpu.pipeline_mode<synchronous>, transform_indices = @transform_3, window_bounds = array<i64: 8, 1>}, {transform_indices = @transform_4, window_bounds = array<i64: 8, 128>}]} {
    %c0 = arith.constant 0 : index
    %c0_0 = arith.constant 0 : index
    %0 = vector.load %arg1[%c0, %c0_0] : memref<16x128xf32, #tpu.memory_space<vmem>>, vector<16x128xf32>
    %c0_1 = arith.constant 0 : index
    %c0_2 = arith.constant 0 : index
    %c0_3 = arith.constant 0 : index
    %1 = vector.load %arg2[%c0_1, %c0_2, %c0_3] : memref<8x16x1xf32, #tpu.memory_space<vmem>>, vector<8x16x1xf32>
    %c0_4 = arith.constant 0 : index
    %c0_5 = arith.constant 0 : index
    %c0_6 = arith.constant 0 : index
    %2 = vector.load %arg3[%c0_4, %c0_5, %c0_6] : memref<8x16x1xf32, #tpu.memory_space<vmem>>, vector<8x16x1xf32>
    %c0_7 = arith.constant 0 : index
    %c0_8 = arith.constant 0 : index
    %3 = vector.load %arg4[%c0_7, %c0_8] : memref<8x1xf32, #tpu.memory_space<vmem>>, vector<8x1xf32>
    %4 = vector.shape_cast %0 : vector<16x128xf32> to vector<1x16x128xf32>
    %5 = vector.broadcast %1 : vector<8x16x1xf32> to vector<8x16x128xf32>
    %6 = vector.broadcast %4 : vector<1x16x128xf32> to vector<8x16x128xf32>
    %7 = arith.mulf %5, %6 : vector<8x16x128xf32>
    %8 = vector.broadcast %2 : vector<8x16x1xf32> to vector<8x16x128xf32>
    %9 = arith.addf %7, %8 : vector<8x16x128xf32>
    %cst = arith.constant dense<0x7F800000> : vector<8x128xf32>
    %10 = vector.multi_reduction <minimumf>, %9, %cst [1] : vector<8x16x128xf32> to vector<8x128xf32>
    %11 = vector.broadcast %3 : vector<8x1xf32> to vector<8x128xf32>
    %12 = arith.mulf %11, %10 : vector<8x128xf32>
    %c0_9 = arith.constant 0 : index
    %c0_10 = arith.constant 0 : index
    %13 = vector.load %arg5[%c0_9, %c0_10] : memref<8x128xf32, #tpu.memory_space<vmem>>, vector<8x128xf32>
    tpu.vector_store %arg5[%c0_9, %c0_10], %12 {strides = array<i32>} : memref<8x128xf32, #tpu.memory_space<vmem>>, vector<8x128xf32>,
    return
  }
  func.func @transform_0(%arg0: i32) -> (i32, i32) {
    %c0_i32 = arith.constant 0 : i32
    %c0_i32_0 = arith.constant 0 : i32
    return %c0_i32, %arg0 : i32, i32
  }
  func.func @transform_1(%arg0: i32) -> (i32, i32, i32) {
    %c0_i32 = arith.constant 0 : i32
    %c0_i32_0 = arith.constant 0 : i32
    %c0_i32_1 = arith.constant 0 : i32
    %c0_i32_2 = arith.constant 0 : i32
    return %c0_i32, %c0_i32_0, %c0_i32_1 : i32, i32, i32
  }
  func.func @transform_2(%arg0: i32) -> (i32, i32, i32) {
    %c0_i32 = arith.constant 0 : i32
    %c0_i32_0 = arith.constant 0 : i32
    %c0_i32_1 = arith.constant 0 : i32
    %c0_i32_2 = arith.constant 0 : i32
    return %c0_i32, %c0_i32_0, %c0_i32_1 : i32, i32, i32
  }
  func.func @transform_3(%arg0: i32) -> (i32, i32) {
    %c0_i32 = arith.constant 0 : i32
    %c0_i32_0 = arith.constant 0 : i32
    %c0_i32_1 = arith.constant 0 : i32
    return %c0_i32, %c0_i32_0 : i32, i32
  }
  func.func @transform_4(%arg0: i32) -> (i32, i32) {
    %c0_i32 = arith.constant 0 : i32
    %c0_i32_0 = arith.constant 0 : i32
    return %c0_i32, %arg0 : i32, i32
  }
}

</mosaic_0001>

<bundles_post_ra>
// kernel: tpu_custom_call.1
= control target key start
LH: loop header
LB: loop body
LE: loop exit
PB: predicated region body
PF: predicated region fallthrough
CT: control target
= control target key end

     0   :  { %9 = vsyncpa [#allocation4], 0  ;;  %s1009_s0 = inlined_call_operand.vmem [shape: f32[16,256], index: 0, kind: input, shape index: {}]   ;;  %s1010_s1 = inlined_call_operand.vmem [shape: f32[8,16,1], index: 1, kind: input, shape index: {}]   ;;  %s1011_s2 = inlined_call_operand.vmem [shape: f32[8,16,1], index: 2, kind: input, shape index: {}]   ;;  %s1012_s3 = inlined_call_operand.vmem [shape: f32[8,1], index: 3, kind: input, shape index: {}]   ;;  %s1013_s4 = inlined_call_operand.hbm [shape: f32[8,256], index: 4, kind: output, shape index: {}]  }
   0x1   :  { %11 = vsyncpa [#allocation4 + $0x1], 0  ;;  %s774_s15 = smov 0   ;;  %s776_s16 = smov 0  }
   0x2   :  { %s778_s17 = smov 0   ;;  %s780_s18 = smov 0  }
   0x3 LB: > { %s628_s19 = sadd.s32 4294967295, %s746_s18   ;;  %s629_s20 = sadd.s32 4294967294, %s746_s18   ;;  %s746_s18 = sphi %s780_s18, %s1019_s18   ;;  %s742_s17 = sphi %s778_s17, %s1018_s17   ;;  %s738_s16 = sphi %s776_s16, %s1017_s16   ;;  %s734_s15 = sphi %s774_s15, %s1016_s15  }
   0x4   : > { %s797_s21 = sadd.s32 1, %s746_s18   ;;  %s24_s22 = sadd.s32 1, %s742_s17 }
   0x5   : > { %s21_s23 = ssub.s32 %s746_s18, %s797_s21  ;;  %p31_p0 = scmp.ne.s32.totalorder %s742_s17, %s738_s16 }
   0x6   : > { %p22_p1 = scmp.eq.s32.totalorder %s21_s23, 0  ;;  %p32_p2 = scmp.eq.s32.totalorder %s746_s18, 0 }
   0x7   : > { %p124_p3 = scmp.eq.s32.totalorder %s628_s19, 1  ;;  %p129_p4 = scmp.ne.s32.totalorder %s738_s16, %s734_s15 }
   0x8   : > { %s810_s24 = scalar_select %p22_p1, %s742_s17, %s24_s22  }
   0x9   : > { %p33_p5 = por %p32_p2, %p31_p0  ;;  %p812_p6 = por %p124_p3, %p31_p0 }
   0xa   : > { %p130_p7 = scmp.eq.s32.totalorder %s629_s20, 1  ;;  %p631_p9 = scmp.ge.s32.totalorder %s746_s18, 2 }
   0xc   : > { %p816_p8 = por %p130_p7, %p129_p4  ;;  %155 = sbr.rel (%p631_p9) target bundleno = 23 (0x17), region = 28 }
  0x11   : > { %158 = sbr.rel (!%p33_p5) target bundleno = 23 (0x17), region = 32  ;;  %s160_s27 = sand.u32 (%p33_p5), 1, %s742_s17  }
  0x12   : > { %s633_s28 = sshll.u32 (%p33_p5), %s746_s18, 3  ;;  %s632_s29 = sshll.u32 (%p33_p5), %s160_s27, 4 }
  0x13   : > { %s164_s6 = scalar_lea.vmem (%p33_p5), %s1009_s0, %s633_s28  ;;  %s162_s7 = scalar_lea.vmem (%p33_p5), [#allocation2], %s632_s29 }
  0x14   : > { %v195_v0 = vld [vmem:[%s164_s6] sm:$0xff] (%p33_p5)  ;;  %v197_v1 = vld [vmem:[%s164_s6 + $0x10] sm:$0xff] (%p33_p5) }
  0x15   : > { %196 = vst [vmem:[%s162_s7] sm:$0xff] (%p33_p5), %v195_v0 }
  0x16   : > { %198 = vst [vmem:[%s162_s7 + $0x8] sm:$0xff] %v197_v1 }
  0x17 PF: > { %p634_p10 = scmp.ge.s32.totalorder %s746_s18, 1  ;;  %p203_p11 = scmp.lt.s32.totalorder %s746_s18, 3 }
  0x19   : > { %p204_p12 = pnand %p634_p10, %p203_p11 }
  0x1a   : > { %s938_s6 = sand.u32 (!%p204_p12), 1, %s738_s16   ;;  %s638_s10 = sshll.u32 (!%p204_p12), %s628_s19, 3 }
  0x1b   : > { %207 = sbr.rel (%p204_p12) target bundleno = 252 (0xfc), region = 70  ;;  %s635_s7 = sshll.u32 (!%p204_p12), %s938_s6, 4 }
  0x1c   : > { %s212_s8 = scalar_lea.vmem (!%p204_p12), [#allocation2], %s635_s7  ;;  %s636_s9 = sshll.u32 (!%p204_p12), %s938_s6, 3 }
  0x1d   : > { %s559_s13 = scalar_lea.hbm (!%p204_p12), %s1013_s4, %s638_s10  ;;  %s234_s14 = scalar_lea.vmem (!%p204_p12), [#allocation3], %s636_s9 }
  0x1e   : > { %s561_s20 = sshll.u32 (!%p204_p12), %s234_s14, 4  ;;  %s563_s22 = sshll.u32 (!%p204_p12), %s559_s13, 4  ;;  %s562_s20 = int_to_ptr.vmem [resolvable:$true] %s561_s20  ;;  %s564_s22 = int_to_ptr.hbm [resolvable:$true] %s563_s22 }
  0x1f   : > { %s549_s19 = scalar_lea.sflag (!%p204_p12), [#allocation4], %s938_s6  ;;  %s698_s23 = sshra.s32 (!%p204_p12), %s564_s22, 4  ;;  %s699_s23 = int_to_ptr.hbm [resolvable:$true] %s698_s23 }
  0x20   : > { %v241_v2 = vld [vmem:[%s1010_s1 + $0x20] sm:$0xff]  ;;  %v239_v3 = vld [vmem:[%s1010_s1 + $0x10] sm:$0xff]  ;;  %v748_v5 = vmov 0   ;;  %v242_v6 = vld [vmem:[%s1010_s1 + $0x28] sm:$0xff]  ;;  %vm531_vm0 = vcmask 1041409   ;;  %vm533_vm1 = vcmask 1042434   ;;  %p705_p2 = scmp.lt.s32.totalorder %s699_s23, %s1013_s4 }
  0x21   : > { %v237_v4 = vld [vmem:[%s1010_s1] sm:$0xff]  ;;  %683 = vset.pattern.permute.xlu2 %v748_v5  ;;  %682 = vset.pattern.permute.xlu1 %v748_v5  ;;  %v240_v7 = vld [vmem:[%s1010_s1 + $0x18] sm:$0xff]  ;;  %v238_v8 = vld [vmem:[%s1010_s1 + $0x8] sm:$0xff]  ;;  %vm535_vm2 = vcmask 1043459   ;;  %vm537_vm3 = vcmask 1044484   ;;  %vm539_vm4 = vcmask 1045509  }
  0x22   : > { %681 = vset.pattern.permute.xlu0 %v748_v5  ;;  %292 = vperm.xlu2 %683, %v241_v2   ;;  %v245_v9 = vld [vmem:[%s1010_s1 + $0x40] sm:$0xff]  ;;  %v244_v10 = vld [vmem:[%s1010_s1 + $0x38] sm:$0xff]  ;;  %v243_v11 = vld [vmem:[%s1010_s1 + $0x30] sm:$0xff]  ;;  %vm541_vm5 = vcmask 1046534   ;;  %vm543_vm6 = vcmask 1047559   ;;  %s700_s27 = scalar_lea.hbm %s699_s23, 8 }
  0x23   : > { %282 = vperm.xlu1 %682, %v239_v3   ;;  %272 = vperm.xlu0 %681, %v237_v4   ;;  %v248_v12 = vld [vmem:[%s1010_s1 + $0x58] sm:$0xff]  ;;  %v247_v13 = vld [vmem:[%s1010_s1 + $0x50] sm:$0xff]  ;;  %v246_v14 = vld [vmem:[%s1010_s1 + $0x48] sm:$0xff]  ;;  %p701_p13 = scmp.ne.s32.totalorder %s699_s23, %s700_s27  ;;  %s704_s30 = scalar_lea.hbm %s1013_s4, 16 }
  0x24   : > { %v251_v15 = vld [vmem:[%s1010_s1 + $0x70] sm:$0xff]  ;;  %v250_v16 = vld [vmem:[%s1010_s1 + $0x68] sm:$0xff]  ;;  %v249_v17 = vld [vmem:[%s1010_s1 + $0x60] sm:$0xff]  ;;  %p706_p3 = scmp.lt.s32.totalorder %s704_s30, %s700_s27 }
  0x25   : > { %v254_v18 = vld [vmem:[%s1011_s2 + $0x8] sm:$0xff]  ;;  %v253_v19 = vld [vmem:[%s1011_s2] sm:$0xff]  ;;  %v252_v20 = vld [vmem:[%s1010_s1 + $0x78] sm:$0xff]  ;;  %p702_p0 = pnand %p701_p13, %p812_p6 }
  0x26   : > { %v257_v21 = vld [vmem:[%s1011_s2 + $0x20] sm:$0xff]  ;;  %v256_v22 = vld [vmem:[%s1011_s2 + $0x18] sm:$0xff]  ;;  %v255_v23 = vld [vmem:[%s1011_s2 + $0x10] sm:$0xff]  ;;  %p707_p4 = por %p706_p3, %p705_p2 }
  0x27   : > { %v260_v24 = vld [vmem:[%s1011_s2 + $0x38] sm:$0xff]  ;;  %v259_v25 = vld [vmem:[%s1011_s2 + $0x30] sm:$0xff]  ;;  %v258_v26 = vld [vmem:[%s1011_s2 + $0x28] sm:$0xff]  ;;  %p703_p1 = pneg %p702_p0 }
  0x28   : > { %v263_v27 = vld [vmem:[%s1011_s2 + $0x50] sm:$0xff]  ;;  %v262_v28 = vld [vmem:[%s1011_s2 + $0x48] sm:$0xff]  ;;  %v261_v29 = vld [vmem:[%s1011_s2 + $0x40] sm:$0xff] }
  0x29   : > { %v266_v30 = vld [vmem:[%s1011_s2 + $0x68] sm:$0xff]  ;;  %v265_v31 = vld [vmem:[%s1011_s2 + $0x60] sm:$0xff]  ;;  %v264_v32 = vld [vmem:[%s1011_s2 + $0x58] sm:$0xff]  ;;  %p708_p5 = pnand %p707_p4, %p703_p1 }
  0x2a   : > { %297 = vperm.xlu2 %683, %v242_v6   ;;  %v269_v33 = vld [vmem:[%s1012_s3] sm:$0xff]  ;;  %v268_v34 = vld [vmem:[%s1011_s2 + $0x78] sm:$0xff]  ;;  %v267_v35 = vld [vmem:[%s1011_s2 + $0x70] sm:$0xff] }
  0x2b   : > { %287 = vperm.xlu1 %682, %v240_v7   ;;  %277 = vperm.xlu0 %681, %v238_v8   ;;  %v945_v52 = vld [vmem:[%s212_s8] sm:$0xff]  ;;  %v947_v53 = vld [vmem:[%s212_s8 + $0x8] sm:$0xff] }
  0x32   : > { %312 = vperm.xlu2 %683, %v245_v9  }
  0x33   : > { %307 = vperm.xlu1 %682, %v244_v10   ;;  %302 = vperm.xlu0 %681, %v243_v11  }
  0x3a   : > { %327 = vperm.xlu2 %683, %v248_v12  }
  0x3b   : > { %322 = vperm.xlu1 %682, %v247_v13   ;;  %317 = vperm.xlu0 %681, %v246_v14  }
  0x42   : > { %342 = vperm.xlu2 %683, %v251_v15  }
  0x43   : > { %337 = vperm.xlu1 %682, %v250_v16   ;;  %332 = vperm.xlu0 %681, %v249_v17  }
  0x4a   : > { %373 = vperm.xlu2 %683, %v254_v18  }
  0x4b   : > { %368 = vperm.xlu1 %682, %v253_v19   ;;  %347 = vperm.xlu0 %681, %v252_v20  }
  0x52   : > { %388 = vperm.xlu2 %683, %v257_v21  }
  0x53   : > { %383 = vperm.xlu1 %682, %v256_v22   ;;  %378 = vperm.xlu0 %681, %v255_v23  }
  0x5a   : > { %403 = vperm.xlu2 %683, %v260_v24  }
  0x5b   : > { %398 = vperm.xlu1 %682, %v259_v25   ;;  %393 = vperm.xlu0 %681, %v258_v26  }
  0x62   : > { %418 = vperm.xlu2 %683, %v263_v27  }
  0x63   : > { %413 = vperm.xlu1 %682, %v262_v28   ;;  %408 = vperm.xlu0 %681, %v261_v29  }
  0x6a   : > { %433 = vperm.xlu2 %683, %v266_v30  }
  0x6b   : > { %428 = vperm.xlu1 %682, %v265_v31   ;;  %423 = vperm.xlu0 %681, %v264_v32  }
  0x72   : > { %520 = vperm.xlu2 %683, %v269_v33  }
  0x73   : > { %443 = vperm.xlu1 %682, %v268_v34   ;;  %438 = vperm.xlu0 %681, %v267_v35  }
  0x7c   : > { %v293_v36 = vpop.permute.xlu2 %292 }
  0x7d   : > { %v354_v10 = vmul.f32 %v293_v36, %v945_v52 }
  0x84   : > { %v298_v37 = vpop.permute.xlu2 %297 }
  0x85   : > { %v355_v11 = vmul.f32 %v298_v37, %v947_v53 }
  0x8c   : > { %v929_v38 = vpop.permute.xlu2 %312 }
  0x8d   : > { %v358_v34 = vmul.f32 %v929_v38, %v945_v52 }
  0x94   : > { %v931_v43 = vpop.permute.xlu2 %327 }
  0x95   : > { %v283_v39 = vpop.permute.xlu1 %282  ;;  %v273_v40 = vpop.permute.xlu0 %272 }
  0x96   : > { %v350_v54 = vmul.f32 %v273_v40, %v945_v52  ;;  %v352_v63 = vmul.f32 %v283_v39, %v945_v52 }
  0x9c   : > { %v933_v46 = vpop.permute.xlu2 %342 }
  0x9d   : > { %v288_v41 = vpop.permute.xlu1 %287  ;;  %v278_v42 = vpop.permute.xlu0 %277 }
  0x9e   : > { %v351_v55 = vmul.f32 %v278_v42, %v947_v53  ;;  %v353_v0 = vmul.f32 %v288_v41, %v947_v53 }
  0xa4   : > { %v374_v49 = vpop.permute.xlu2 %373 }
  0xa5   : > { %v308_v44 = vpop.permute.xlu1 %307  ;;  %v303_v45 = vpop.permute.xlu0 %302  ;;  %v447_v59 = vadd.f32 %v374_v49, %v351_v55 }
  0xa6   : > { %v356_v16 = vmul.f32 %v303_v45, %v945_v52  ;;  %v357_v20 = vmul.f32 %v308_v44, %v947_v53 }
  0xac   : > { %v389_v56 = vpop.permute.xlu2 %388 }
  0xad   : > { %v935_v47 = vpop.permute.xlu1 %322  ;;  %v318_v48 = vpop.permute.xlu0 %317  ;;  %v450_v17 = vadd.f32 %v389_v56, %v354_v10 }
  0xae   : > { %v359_v29 = vmul.f32 %v318_v48, %v947_v53  ;;  %v361_v48 = vmul.f32 %v931_v43, %v947_v53 }
  0xb4   : > { %v404_v6 = vpop.permute.xlu2 %403 }
  0xb5   : > { %v941_v50 = vpop.permute.xlu1 %337  ;;  %v943_v51 = vpop.permute.xlu0 %332  ;;  %v453_v26 = vadd.f32 %v404_v6, %v357_v20 }
  0xb6   : > { %v363_v38 = vmul.f32 %v941_v50, %v947_v53  ;;  %v364_v50 = vmul.f32 %v933_v46, %v945_v52 }
  0xbc   : > { %v419_v25 = vpop.permute.xlu2 %418 }
  0xbd   : > { %v369_v57 = vpop.permute.xlu1 %368  ;;  %v951_v58 = vpop.permute.xlu0 %347 }
  0xbe   : > { %v446_v60 = vadd.f32 %v369_v57, %v350_v54  ;;  %v360_v54 = vmul.f32 %v935_v47, %v945_v52  ;;  %v362_v57 = vmul.f32 %v943_v51, %v945_v52  ;;  %v365_v51 = vmul.f32 %v951_v58, %v947_v53 }
  0xc0   : > { %v462_v61 = vmin.f32 %v446_v60, %v447_v59 }
  0xc2   : > { %v463_v62 = vrot.slane %v462_v61, 4 }
  0xc4   : > { %v464_v1 = vmin.f32 %v462_v61, %v463_v62  ;;  %v434_v55 = vpop.permute.xlu2 %433  ;;  %v456_v61 = vadd.f32 %v419_v25, %v360_v54 }
  0xc5   : > { %v384_v2 = vpop.permute.xlu1 %383  ;;  %v379_v3 = vpop.permute.xlu0 %378 }
  0xc6   : > { %v449_v4 = vadd.f32 %v384_v2, %v353_v0  ;;  %v448_v5 = vadd.f32 %v379_v3, %v352_v63  ;;  %v465_v7 = vrot.slane %v464_v1, 2 }
  0xc8   : > { %v469_v8 = vmin.f32 %v448_v5, %v449_v4  ;;  %v466_v12 = vmin.f32 %v464_v1, %v465_v7  ;;  %v459_v1 = vadd.f32 %v434_v55, %v363_v38 }
  0xca   : > { %v470_v9 = vrot.slane %v469_v8, 4  ;;  %v467_v21 = vrot.slane %v466_v12, 1 }
  0xcc   : > { %v471_v13 = vmin.f32 %v469_v8, %v470_v9  ;;  %v468_v30 = vmin.f32 %v466_v12, %v467_v21 }
  0xcd   : > { %v399_v14 = vpop.permute.xlu1 %398  ;;  %v394_v15 = vpop.permute.xlu0 %393 }
  0xce   : > { %v472_v18 = vrot.slane %v471_v13, 2  ;;  %v451_v19 = vadd.f32 %v394_v15, %v355_v11  ;;  %v452_v23 = vadd.f32 %v399_v14, %v356_v16 }
  0xd0   : > { %v473_v22 = vmin.f32 %v471_v13, %v472_v18  ;;  %v476_v24 = vmin.f32 %v450_v17, %v451_v19  ;;  %v483_v32 = vmin.f32 %v452_v23, %v453_v26 }
  0xd2   : > { %v474_v27 = vrot.slane %v473_v22, 1  ;;  %v477_v28 = vrot.slane %v476_v24, 4  ;;  %v484_v42 = vrot.slane %v483_v32, 4 }
  0xd4   : > { %v475_v31 = vmin.f32 %v473_v22, %v474_v27  ;;  %v478_v33 = vmin.f32 %v476_v24, %v477_v28  ;;  %v485_v59 = vmin.f32 %v483_v32, %v484_v42 }
  0xd5   : > { %v414_v35 = vpop.permute.xlu1 %413  ;;  %v409_v36 = vpop.permute.xlu0 %408 }
  0xd6   : > { %v532_v37 = vsel %vm531_vm0, %v475_v31, %v468_v30  ;;  %v479_v39 = vrot.slane %v478_v33, 2  ;;  %v455_v40 = vadd.f32 %v414_v35, %v359_v29  ;;  %v454_v41 = vadd.f32 %v409_v36, %v358_v34  ;;  %v521_v36 = vpop.permute.xlu2 %520 }
  0xd7   : > { %v486_v47 = vrot.slane %v485_v59, 2 }
  0xd8   : > { %v480_v44 = vmin.f32 %v478_v33, %v479_v39  ;;  %v490_v45 = vmin.f32 %v454_v41, %v455_v40 }
  0xd9   : > { %v487_v9 = vmin.f32 %v485_v59, %v486_v47 }
  0xda   : > { %v481_v49 = vrot.slane %v480_v44, 1  ;;  %v491_v56 = vrot.slane %v490_v45, 4 }
  0xdb   : > { %v488_v19 = vrot.slane %v487_v9, 1 }
  0xdc   : > { %v482_v60 = vmin.f32 %v480_v44, %v481_v49  ;;  %v492_v62 = vmin.f32 %v490_v45, %v491_v56 }
  0xdd   : > { %v429_v63 = vpop.permute.xlu1 %428  ;;  %v424_v0 = vpop.permute.xlu0 %423  ;;  %v489_v53 = vmin.f32 %v487_v9, %v488_v19 }
  0xde   : > { %v534_v43 = vsel %vm533_vm1, %v482_v60, %v532_v37  ;;  %v458_v2 = vadd.f32 %v429_v63, %v362_v57  ;;  %v457_v3 = vadd.f32 %v424_v0, %v361_v48  ;;  %v493_v6 = vrot.slane %v492_v62, 2 }
  0xdf   : > { %v536_v28 = vsel %vm535_vm2, %v489_v53, %v534_v43 }
  0xe0   : > { %v504_v4 = vmin.f32 %v458_v2, %v459_v1  ;;  %v497_v5 = vmin.f32 %v456_v61, %v457_v3  ;;  %v494_v12 = vmin.f32 %v492_v62, %v493_v6 }
  0xe2   : > { %v505_v7 = vrot.slane %v504_v4, 4  ;;  %v498_v8 = vrot.slane %v497_v5, 4  ;;  %v495_v22 = vrot.slane %v494_v12, 1 }
  0xe4   : > { %v506_v10 = vmin.f32 %v504_v4, %v505_v7  ;;  %v499_v11 = vmin.f32 %v497_v5, %v498_v8  ;;  %v496_v24 = vmin.f32 %v494_v12, %v495_v22 }
  0xe5   : > { %v444_v13 = vpop.permute.xlu1 %443  ;;  %v439_v14 = vpop.permute.xlu0 %438 }
  0xe6   : > { %v507_v15 = vrot.slane %v506_v10, 2  ;;  %v500_v16 = vrot.slane %v499_v11, 2  ;;  %v461_v17 = vadd.f32 %v444_v13, %v365_v51  ;;  %v460_v18 = vadd.f32 %v439_v14, %v364_v50 }
  0xe7   : > { %v538_v30 = vsel %vm537_vm3, %v496_v24, %v536_v28 }
  0xe8   : > { %v501_v20 = vmin.f32 %v499_v11, %v500_v16  ;;  %v511_v21 = vmin.f32 %v460_v18, %v461_v17  ;;  %v508_v46 = vmin.f32 %v506_v10, %v507_v15 }
  0xea   : > { %v502_v52 = vrot.slane %v501_v20, 1  ;;  %v512_v23 = vrot.slane %v511_v21, 4  ;;  %v509_v25 = vrot.slane %v508_v46, 1 }
  0xec   : > { %v513_v58 = vmin.f32 %v511_v21, %v512_v23  ;;  %v503_v26 = vmin.f32 %v501_v20, %v502_v52  ;;  %v510_v31 = vmin.f32 %v508_v46, %v509_v25 }
  0xee   : > { %v514_v27 = vrot.slane %v513_v58, 2  ;;  %v540_v33 = vsel %vm539_vm4, %v503_v26, %v538_v30 }
  0xef   : > { %v542_v35 = vsel %vm541_vm5, %v510_v31, %v540_v33 }
  0xf0   : > { %v515_v29 = vmin.f32 %v513_v58, %v514_v27 }
  0xf2   : > { %v516_v32 = vrot.slane %v515_v29, 1 }
  0xf4   : > { %v517_v34 = vmin.f32 %v515_v29, %v516_v32 }
  0xf6   : > { %v544_v37 = vsel %vm543_vm6, %v517_v34, %v542_v35 }
  0xf7   : > { %v546_v39 = vmul.f32 %v544_v37, %v521_v36 }
  0xf9   : > { %547 = vst [vmem:[%s234_s14] sm:$0xff] %v546_v39 }
  0xfa   : > { %711 = shalt.err (!%p708_p5)
}
  0xfb   : > { %641 = dma.vmem_to_hbm [thread:$0]  (%p812_p6), %s562_s20, 128, %s564_s22, %s549_s19  }
  0xfc PF: > { %s575_s6 = sand.u32 1, %s734_s15   ;;  %p644_p7 = pnand %p631_p9, %p816_p8 }
  0xfd   : > { %s576_s8 = scalar_lea.sflag [#allocation4], %s575_s6 }
  0xfe   : > { %p645_p10 = pneg %p644_p7 }
 0x100   : > { %729 = dma.done.wait (%p645_p10), %s576_s8, 128  }
 0x101   : > { %731 = vsyncadd (%p645_p10), %s576_s8, 4294967168  ;;  %p14_p11 = scmp.ge.s32.totalorder %s797_s21, 4   ;;  %s1016_s15 = smov %s738_s16 }
 0x102   : > { %s1017_s16 = smov %s742_s17  ;;  %s1018_s17 = smov %s810_s24 }
 0x103   : > { %s1019_s18 = smov %s797_s21  ;;  %16 = sbr.rel (!%p14_p11) target bundleno = 3 (0x3), region = 114 }
 0x108   :  { %582 = vsyncpa [#allocation4], 1 }
 0x109   :  { %584 = vsyncpa [#allocation4 + $0x1], 1 }

</bundles_post_ra>
